<compile_context>
chip_gen: v6e
topology: v6e:2x2x1
jax: 0.10.0
libtpu: 0.0.40
codegen_flags: <defaults>
</compile_context>

<pallas_src>
import jax
import jax.numpy as jnp
from jax.experimental import pallas as pl
from jax.experimental.pallas import tpu as pltpu


def _round_up(a, b):
    return ((a + b - 1) // b) * b


# ----------------------------------------------------------------------------
# Kernel 1: exact Residual semantics  out = fn_out + x   (elementwise add)
# ----------------------------------------------------------------------------
def _residual_add_kernel(y_ref, x_ref, o_ref):
    o_ref[...] = y_ref[...] + x_ref[...]


def residual_pallas(fn, x, **kwargs):
    """out = fn(x, **kwargs) + x ; the add runs in a tiled Pallas kernel."""
    y = fn(x, **kwargs)
    assert y.shape == x.shape, "Residual requires fn to preserve shape"
    out_dtype = jnp.result_type(y.dtype, x.dtype)

    yf = y.astype(out_dtype).reshape(-1)
    xf = x.astype(out_dtype).reshape(-1)
    n = int(xf.shape[0])

    # Lane-dense layout: last dim a large multiple of 128 (elementwise op, so
    # the reshape is free layout plumbing).
    lane = 1024 if n >= 8 * 1024 else 128
    sub = 16                                   # multiple of 8 (f32) and 16 (bf16)
    rows = -(-n // lane)
    tm = min(512, _round_up(rows, sub))        # rows per tile
    rows_p = _round_up(rows, tm)
    n_p = rows_p * lane
    if n_p != n:                               # zero-pad the ragged tail
        yf = jnp.pad(yf, (0, n_p - n))
        xf = jnp.pad(xf, (0, n_p - n))
    y2 = yf.reshape(rows_p, lane)
    x2 = xf.reshape(rows_p, lane)

    itemsize = jnp.dtype(out_dtype).itemsize
    out = pl.pallas_call(
        _residual_add_kernel,
        out_shape=jax.ShapeDtypeStruct((rows_p, lane), out_dtype),
        grid_spec=pl.GridSpec(
            grid=(rows_p // tm,),
            in_specs=[
                pl.BlockSpec((tm, lane), lambda i: (i, 0)),
                pl.BlockSpec((tm, lane), lambda i: (i, 0)),
            ],
            out_specs=pl.BlockSpec((tm, lane), lambda i: (i, 0)),
        ),
        compiler_params=pltpu.CompilerParams(
            dimension_semantics=("parallel",),
            vmem_limit_bytes=32 * 1024 * 1024,
        ),
        cost_estimate=pl.CostEstimate(
            flops=n, transcendentals=0, bytes_accessed=3 * n * itemsize),
        input_output_aliases={0: 0},           # write result into y's buffer
    )(y2, x2)

    return out.reshape(-1)[:n].reshape(x.shape)


# ----------------------------------------------------------------------------
# Kernel 2: fused demo, fn = Linear(D, D):  out = (x @ W + b) + x
# ----------------------------------------------------------------------------
def _fused_linear_residual_kernel(x_ref, w_ref, b_ref, o_ref):
    x = x_ref[...]
    y = jnp.dot(x, w_ref[...], preferred_element_type=jnp.float32)
    y = y + b_ref[...].astype(jnp.float32)     # (1, D) broadcasts over rows
    o_ref[...] = (y + x.astype(jnp.float32)).astype(o_ref.dtype)


def fused_linear_residual(x, w, b, *, tm_max=256):
    orig_shape = x.shape
    d = orig_shape[-1]
    m = 1
    for s in orig_shape[:-1]:
        m *= int(s)
    x2 = x.reshape(m, d)
    b2 = b.reshape(1, d)

    # Row tiling: W stays resident, x/out stream in TM-row tiles.
    tm = min(tm_max, _round_up(m, 8))
    m_p = _round_up(m, tm)
    if m_p != m:
        x2 = jnp.pad(x2, ((0, m_p - m), (0, 0)))

    itemsize = jnp.dtype(x.dtype).itemsize
    out = pl.pallas_call(
        _fused_linear_residual_kernel,
        out_shape=jax.ShapeDtypeStruct((m_p, d), x.dtype),
        grid_spec=pl.GridSpec(
            grid=(m_p // tm,),
            in_specs=[
                pl.BlockSpec((tm, d), lambda i: (i, 0)),
                pl.BlockSpec((d, d), lambda i: (0, 0)),   # W resident
                pl.BlockSpec((1, d), lambda i: (0, 0)),   # bias resident
            ],
            out_specs=pl.BlockSpec((tm, d), lambda i: (i, 0)),
        ),
        compiler_params=pltpu.CompilerParams(
            dimension_semantics=("parallel",),
            vmem_limit_bytes=32 * 1024 * 1024,
        ),
        cost_estimate=pl.CostEstimate(
            flops=2 * m * d * d + 2 * m * d,
            transcendentals=0,
            bytes_accessed=(2 * m * d + d * d + d) * itemsize),
        # TODO(synk): add a K/N grid axis + VMEM f32 accumulator for large D
        # (W resident is only valid while (D, D) fits comfortably in VMEM).
    )(x2, w, b2)

    return out[:m].reshape(orig_shape)


if __name__ == "__main__":
    key = jax.random.PRNGKey(0)
    kx, kw, kb = jax.random.split(key, 3)

    # Small shapes implied by a typical Residual usage: (batch=2, seq=8, hidden=32)
    B, S, D = 2, 8, 32
    x = jax.random.normal(kx, (B, S, D), dtype=jnp.float32)

    # Deterministic parameters for the demo fn (Linear D->D).
    w = jax.random.normal(kw, (D, D), dtype=jnp.float32) * 0.05
    b = jax.random.normal(kb, (D,), dtype=jnp.float32) * 0.05

    def fn(v):                                 # the wrapped sub-module fn(x)
        return v @ w + b

    # Path 1: exact Residual semantics (fn in JAX, residual add in Pallas).
    out_generic = residual_pallas(fn, x)
    # Path 2: fully fused Pallas kernel (matmul + bias + residual add).
    out_fused = fused_linear_residual(x, w, b)
    jax.block_until_ready(out_generic)
    jax.block_until_ready(out_fused)

    # Reference: fn(x) + x in plain JAX.
    ref = fn(x) + x
    assert out_generic.shape == x.shape and out_generic.dtype == x.dtype
    assert out_fused.shape == x.shape and out_fused.dtype == x.dtype
    assert jnp.allclose(out_generic, ref, atol=1e-5, rtol=1e-5)
    assert jnp.allclose(out_fused, ref, atol=1e-5, rtol=1e-5)

    print("KERNEL_OK")
</pallas_src>

<mosaic_0001>
module attributes {stable_mosaic.version = 11 : i64} {
  func.func @_residual_add_kernel(%arg0: i32, %arg1: memref<16x128xf32, #tpu.memory_space<vmem>>, %arg2: memref<16x128xf32, #tpu.memory_space<vmem>>, %arg3: memref<16x128xf32, #tpu.memory_space<vmem>>) attributes {dimension_semantics = [#tpu.dimension_semantics<parallel>], iteration_bounds = array<i64: 1>, scalar_prefetch = 0 : i64, scratch_operands = 0 : i64, tpu.core_type = #tpu.core_type<tc>, window_params = [{transform_indices = @transform_0, window_bounds = array<i64: 16, 128>}, {transform_indices = @transform_1, window_bounds = array<i64: 16, 128>}, {transform_indices = @transform_2, window_bounds = array<i64: 16, 128>}]} {
    %c0 = arith.constant 0 : index
    %c0_0 = arith.constant 0 : index
    %0 = vector.load %arg1[%c0, %c0_0] : memref<16x128xf32, #tpu.memory_space<vmem>>, vector<16x128xf32>
    %c0_1 = arith.constant 0 : index
    %c0_2 = arith.constant 0 : index
    %1 = vector.load %arg2[%c0_1, %c0_2] : memref<16x128xf32, #tpu.memory_space<vmem>>, vector<16x128xf32>
    %2 = arith.addf %0, %1 : vector<16x128xf32>
    %c0_3 = arith.constant 0 : index
    %c0_4 = arith.constant 0 : index
    %3 = vector.load %arg3[%c0_3, %c0_4] : memref<16x128xf32, #tpu.memory_space<vmem>>, vector<16x128xf32>
    tpu.vector_store %arg3[%c0_3, %c0_4], %2 {strides = array<i32>} : memref<16x128xf32, #tpu.memory_space<vmem>>, vector<16x128xf32>,
    return
  }
  func.func @transform_0(%arg0: i32) -> (i32, i32) {
    %c0_i32 = arith.constant 0 : i32
    %c0_i32_0 = arith.constant 0 : i32
    return %arg0, %c0_i32 : i32, i32
  }
  func.func @transform_1(%arg0: i32) -> (i32, i32) {
    %c0_i32 = arith.constant 0 : i32
    %c0_i32_0 = arith.constant 0 : i32
    return %arg0, %c0_i32 : i32, i32
  }
  func.func @transform_2(%arg0: i32) -> (i32, i32) {
    %c0_i32 = arith.constant 0 : i32
    %c0_i32_0 = arith.constant 0 : i32
    return %arg0, %c0_i32 : i32, i32
  }
}

</mosaic_0001>

<bundles_post_ra>
// kernel: tpu_custom_call.1
= control target key start
LH: loop header
LB: loop body
LE: loop exit
PB: predicated region body
PF: predicated region fallthrough
CT: control target
= control target key end

     0   :  { %7 = vsyncpa [#allocation3], 0  ;;  %s130_s0 = inlined_call_operand.hbm [shape: f32[16,128], index: 0, kind: input, shape index: {}, may-alias: {0,2}]   ;;  %s131_s1 = inlined_call_operand.vmem [shape: f32[16,128], index: 1, kind: input, shape index: {}]   ;;  %s132_s2 = inlined_call_operand.hbm [shape: f32[16,128], index: 2, kind: output, shape index: {}, may-alias: {0,2}]  }
   0x1   :  { %8 = vsyncpa [#allocation4], 0  ;;  %s99_s9 = smov [#allocation2]  }
   0x2   :  { %s14_s10 = sshll.u32 %s99_s9, 4  ;;  %s15_s10 = int_to_ptr.vmem [resolvable:$true] %s14_s10 }
   0x3   :  { %s63_s11 = scalar_lea.vmem %s15_s10, 256  ;;  %p68_p1 = scmp.lt.s32.totalorder %s15_s10, %s15_s10 }
   0x4   :  { %p64_p0 = scmp.ne.s32.totalorder %s15_s10, %s63_s11  ;;  %p69_p2 = scmp.lt.s32.totalorder %s63_s11, %s63_s11 }
   0x6   :  { %p70_p3 = por %p69_p2, %p68_p1 }
   0x8   :  { %p71_p4 = pnand %p70_p3, %p64_p0 }
   0xa   :  { %74 = shalt.err (!%p71_p4)
}
   0xb   :  { %s100_s12 = smov 128   ;;  %s101_s13 = smov 8  }
   0xc   :  { %20 = dma.hbm_to_vmem [thread:$0]  %s130_s0, 256, %s15_s10, [#allocation3], %s100_s12, %s100_s12, %s101_s13  }
   0xd   :  { %95 = dma.done.wait [#allocation3], 256  }
   0xe   :  { %96 = vsyncadd [#allocation3], 4294967040  ;;  %s102_s16 = smov [#allocation5]   ;;  %v26_v0 = vld [vmem:[#allocation2] sm:$0xff]  ;;  %v27_v2 = vld [vmem:[#allocation2 + $0x8] sm:$0xff] }
   0xf   :  { %s39_s17 = sshll.u32 %s102_s16, 4  ;;  %v28_v1 = vld [vmem:[%s131_s1] sm:$0xff]  ;;  %v29_v4 = vld [vmem:[%s131_s1 + $0x8] sm:$0xff]  ;;  %s40_s17 = int_to_ptr.vmem [resolvable:$true] %s39_s17 }
  0x10   :  { %v30_v3 = vadd.f32 %v28_v1, %v26_v0  ;;  %v31_v5 = vadd.f32 %v29_v4, %v27_v2  ;;  %s75_s0 = scalar_lea.vmem %s40_s17, 256  ;;  %p80_p6 = scmp.lt.s32.totalorder %s40_s17, %s40_s17 }
  0x11   :  { %p76_p5 = scmp.ne.s32.totalorder %s40_s17, %s75_s0  ;;  %p81_p7 = scmp.lt.s32.totalorder %s75_s0, %s75_s0 }
  0x12   :  { %32 = vst [vmem:[#allocation5] sm:$0xff] %v30_v3  ;;  %33 = vst [vmem:[#allocation5 + $0x8] sm:$0xff] %v31_v5 }
  0x13   :  { %p82_p8 = por %p81_p7, %p80_p6 }
  0x15   :  { %p83_p9 = pnand %p82_p8, %p76_p5 }
  0x17   :  { %86 = shalt.err (!%p83_p9)
}
  0x18   :  { %45 = dma.vmem_to_hbm [thread:$0]  %s40_s17, 256, %s132_s2, [#allocation4], %s100_s12, %s100_s12, %s101_s13  }
  0x19   :  { %97 = dma.done.wait [#allocation4], 256  }
  0x1a   :  { %98 = vsyncadd [#allocation4], 4294967040 }
  0x1b   :  { %49 = vsyncpa [#allocation3], 1 }
  0x1c   :  { %50 = vsyncpa [#allocation4], 1 }

</bundles_post_ra>
